<compile_context>
chip_gen: v7x
topology: tpu7x:2x2x1
jax: 0.10.0
libtpu: 0.0.40
codegen_flags: <defaults>
</compile_context>

<pallas_src>
import jax
import jax.numpy as jnp
from jax.experimental import pallas as pl
from jax.experimental.pallas import tpu as pltpu


def _round_up(a, m):
    return (a + m - 1) // m * m


def residual_block_kernel(xcol_ref, xres_ref, wt_ref, ws_ref, bt_ref, bs_ref,
                          w2_ref, b2_ref, o_ref):
    """One lane tile per grid step.

    xcol_ref : (K*Cp, tN)  im2col'd input (compute dtype, e.g. bf16)
    xres_ref : (Cp,   tN)  original input for the residual add (f32)
    wt_ref   : (Cp, K*Cp)  dilated-conv weight, tanh half (compute dtype)
    ws_ref   : (Cp, K*Cp)  dilated-conv weight, sigmoid half (compute dtype)
    bt_ref   : (Cp, 1)     f32
    bs_ref   : (Cp, 1)     f32
    w2_ref   : (Cp, Cp)    1x1-conv weight (compute dtype)
    b2_ref   : (Cp, 1)     f32
    o_ref    : (Cp, tN)
    """
    xcol = xcol_ref[...]                                      # (K*Cp, tN)

    # Fused dilated causal conv: single MXU matmul per half, contraction K*Cp.
    a_t = jnp.dot(wt_ref[...], xcol,
                  preferred_element_type=jnp.float32) + bt_ref[...]
    a_s = jnp.dot(ws_ref[...], xcol,
                  preferred_element_type=jnp.float32) + bs_ref[...]

    # Gated activation (f32 on the EUP — portable to v5e).
    gated = jnp.tanh(a_t) * jax.nn.sigmoid(a_s)               # (Cp, tN) f32

    # 1x1 conv + residual.
    y = jnp.dot(w2_ref[...], gated.astype(w2_ref.dtype),
                preferred_element_type=jnp.float32) + b2_ref[...]
    o_ref[...] = (y + xres_ref[...].astype(jnp.float32)).astype(o_ref.dtype)


def residual_block(x, w1, b1, w2, b2, *, kernel_size, dilation,
                   compute_dtype=jnp.bfloat16, lane_tile=1024):
    """x: (B, C, T). w1: (2C, C, K), b1: (2C,), w2: (C, C, 1), b2: (C,)."""
    B, C, T = x.shape
    K, d = kernel_size, dilation
    pad = (K - 1) * d

    Cp = _round_up(C, 8)                      # sublane-aligned channel count
    kcp = K * Cp

    # ---- lane tiling: fold batch into the lane axis, tile in 128-multiples ----
    N = B * T
    lane_tile = max(128, _round_up(lane_tile, 128))
    tN = _round_up(N, 128) if N <= lane_tile else lane_tile
    Np = _round_up(N, tN)
    num_tiles = Np // tN

    # ---- wrapper-side layout (pure XLA glue) ----
    # Left-pad time for causality, zero-pad channels to Cp.
    xp = jnp.pad(x, ((0, 0), (0, Cp - C), (pad, 0)))            # (B, Cp, T+pad)
    # im2col: xcol[b, k*Cp + ic, t] = xp[b, ic, t + k*d]  (pre-shifted, aligned rows)
    taps = [xp[:, :, k * d: k * d + T] for k in range(K)]
    xcol = jnp.concatenate(taps, axis=1)                        # (B, K*Cp, T)
    xcol = jnp.transpose(xcol, (1, 0, 2)).reshape(kcp, N)       # (K*Cp, B*T)
    xcol = jnp.pad(xcol, ((0, 0), (0, Np - N))).astype(compute_dtype)

    xres = jnp.pad(x, ((0, 0), (0, Cp - C), (0, 0)))            # (B, Cp, T)
    xres = jnp.transpose(xres, (1, 0, 2)).reshape(Cp, N)        # (Cp, B*T)
    xres = jnp.pad(xres, ((0, 0), (0, Np - N)))                 # f32

    # Split conv1 weight into tanh / sigmoid halves, tap-major packing:
    #   W[oc, k*Cp + ic] = w1[oc, ic, k]
    def pack(w):                                                # (C, C, K) -> (Cp, K*Cp)
        w = jnp.transpose(w, (0, 2, 1))                         # (C, K, C)
        w = jnp.pad(w, ((0, Cp - C), (0, 0), (0, Cp - C)))      # (Cp, K, Cp)
        return w.reshape(Cp, kcp)

    wt = pack(w1[:C]).astype(compute_dtype)
    ws = pack(w1[C:]).astype(compute_dtype)
    bt = jnp.pad(b1[:C], (0, Cp - C)).reshape(Cp, 1).astype(jnp.float32)
    bs = jnp.pad(b1[C:], (0, Cp - C)).reshape(Cp, 1).astype(jnp.float32)
    w2r = jnp.pad(w2[:, :, 0], ((0, Cp - C), (0, Cp - C))).astype(compute_dtype)
    b2r = jnp.pad(b2, (0, Cp - C)).reshape(Cp, 1).astype(jnp.float32)

    # ---- VMEM budget from the chosen tiles (double-buffered I/O + intermediates) ----
    cbytes = jnp.dtype(compute_dtype).itemsize
    xbytes = jnp.dtype(x.dtype).itemsize
    block_bytes = kcp * tN * cbytes + Cp * tN * 4 + Cp * tN * xbytes
    weight_bytes = (2 * Cp * kcp + Cp * Cp) * cbytes + 3 * Cp * 4
    inter_bytes = 4 * Cp * tN * 4
    vmem_bytes = int(2 * (block_bytes + weight_bytes) + inter_bytes + (4 << 20))
    vmem_bytes = max(vmem_bytes, 16 << 20)

    out = pl.pallas_call(
        residual_block_kernel,
        out_shape=jax.ShapeDtypeStruct((Cp, Np), x.dtype),
        grid=(num_tiles,),
        in_specs=[
            pl.BlockSpec((kcp, tN), lambda n: (0, n)),   # xcol  (streamed)
            pl.BlockSpec((Cp, tN), lambda n: (0, n)),    # xres  (streamed)
            pl.BlockSpec((Cp, kcp), lambda n: (0, 0)),   # wt    (resident)
            pl.BlockSpec((Cp, kcp), lambda n: (0, 0)),   # ws
            pl.BlockSpec((Cp, 1), lambda n: (0, 0)),     # bt
            pl.BlockSpec((Cp, 1), lambda n: (0, 0)),     # bs
            pl.BlockSpec((Cp, Cp), lambda n: (0, 0)),    # w2
            pl.BlockSpec((Cp, 1), lambda n: (0, 0)),     # b2
        ],
        out_specs=pl.BlockSpec((Cp, tN), lambda n: (0, n)),
        compiler_params=pltpu.CompilerParams(
            dimension_semantics=("parallel",),
            vmem_limit_bytes=vmem_bytes),
    )(xcol, xres, wt, ws, bt, bs, w2r, b2r)

    # Un-fold: (Cp, Np) -> (B, C, T)
    out = out[:, :N].reshape(Cp, B, T)
    return jnp.transpose(out, (1, 0, 2))[:, :C, :]


def residual_block_ref(x, w1, b1, w2, b2, *, kernel_size, dilation):
    """Pure-JAX f32 reference with identical semantics (for verification)."""
    B, C, T = x.shape
    pad = (kernel_size - 1) * dilation
    xp = jnp.pad(x, ((0, 0), (0, 0), (pad, 0)))
    a = jnp.zeros((B, 2 * C, T), jnp.float32)
    for k in range(kernel_size):
        a = a + jnp.einsum('oi,bit->bot', w1[:, :, k],
                           xp[:, :, k * dilation: k * dilation + T])
    a = a + b1[None, :, None]
    gated = jnp.tanh(a[:, :C, :]) * jax.nn.sigmoid(a[:, C:, :])
    y = jnp.einsum('oi,bit->bot', w2[:, :, 0], gated) + b2[None, :, None]
    return y + x


if __name__ == "__main__":
    B, C, T = 2, 4, 16
    K, DIL = 3, 2

    key = jax.random.PRNGKey(0)
    k_x, k_w1, k_b1, k_w2, k_b2 = jax.random.split(key, 5)

    x = jax.random.normal(k_x, (B, C, T), dtype=jnp.float32)
    # Deterministic synthetic parameters (shapes match nn.Conv1d weights/biases).
    w1 = 0.3 * jax.random.normal(k_w1, (2 * C, C, K), dtype=jnp.float32)   # conv1.weight
    b1 = 0.1 * jax.random.normal(k_b1, (2 * C,), dtype=jnp.float32)        # conv1.bias
    w2 = 0.3 * jax.random.normal(k_w2, (C, C, 1), dtype=jnp.float32)       # conv2.weight
    b2 = 0.1 * jax.random.normal(k_b2, (C,), dtype=jnp.float32)            # conv2.bias

    ref = residual_block_ref(x, w1, b1, w2, b2, kernel_size=K, dilation=DIL)

    # f32 MXU operands: tight check.
    out_f32 = residual_block(x, w1, b1, w2, b2, kernel_size=K, dilation=DIL,
                             compute_dtype=jnp.float32)
    out_f32 = jax.block_until_ready(out_f32)
    assert out_f32.shape == (B, C, T)
    assert jnp.allclose(out_f32, ref, atol=1e-4, rtol=1e-4), "f32 mismatch vs reference"

    # bf16 MXU operands (default / fast path on v6e & v7x): loose check.
    out_bf16 = residual_block(x, w1, b1, w2, b2, kernel_size=K, dilation=DIL,
                              compute_dtype=jnp.bfloat16)
    out_bf16 = jax.block_until_ready(out_bf16)
    assert out_bf16.shape == (B, C, T)
    assert jnp.allclose(out_bf16, ref, atol=5e-2, rtol=5e-2), "bf16 mismatch vs reference"

    print("KERNEL_OK")
</pallas_src>

<mosaic_0001>
module attributes {stable_mosaic.version = 11 : i64} {
  func.func @residual_block_kernel(%arg0: i32, %arg1: memref<24x128xf32, #tpu.memory_space<vmem>>, %arg2: memref<8x128xf32, #tpu.memory_space<vmem>>, %arg3: memref<8x24xf32, #tpu.memory_space<vmem>>, %arg4: memref<8x24xf32, #tpu.memory_space<vmem>>, %arg5: memref<8x1xf32, #tpu.memory_space<vmem>>, %arg6: memref<8x1xf32, #tpu.memory_space<vmem>>, %arg7: memref<8x8xf32, #tpu.memory_space<vmem>>, %arg8: memref<8x1xf32, #tpu.memory_space<vmem>>, %arg9: memref<8x128xf32, #tpu.memory_space<vmem>>) attributes {dimension_semantics = [#tpu.dimension_semantics<parallel>], iteration_bounds = array<i64: 1>, scalar_prefetch = 0 : i64, scratch_operands = 0 : i64, tpu.core_type = #tpu.core_type<tc>, window_params = [{transform_indices = @transform_0, window_bounds = array<i64: 24, 128>}, {transform_indices = @transform_1, window_bounds = array<i64: 8, 128>}, {pipeline_mode = #tpu.pipeline_mode<synchronous>, transform_indices = @transform_2, window_bounds = array<i64: 8, 24>}, {pipeline_mode = #tpu.pipeline_mode<synchronous>, transform_indices = @transform_3, window_bounds = array<i64: 8, 24>}, {pipeline_mode = #tpu.pipeline_mode<synchronous>, transform_indices = @transform_4, window_bounds = array<i64: 8, 1>}, {pipeline_mode = #tpu.pipeline_mode<synchronous>, transform_indices = @transform_5, window_bounds = array<i64: 8, 1>}, {pipeline_mode = #tpu.pipeline_mode<synchronous>, transform_indices = @transform_6, window_bounds = array<i64: 8, 8>}, {pipeline_mode = #tpu.pipeline_mode<synchronous>, transform_indices = @transform_7, window_bounds = array<i64: 8, 1>}, {transform_indices = @transform_8, window_bounds = array<i64: 8, 128>}]} {
    %c0 = arith.constant 0 : index
    %c0_0 = arith.constant 0 : index
    %0 = vector.load %arg1[%c0, %c0_0] : memref<24x128xf32, #tpu.memory_space<vmem>>, vector<24x128xf32>
    %c0_1 = arith.constant 0 : index
    %c0_2 = arith.constant 0 : index
    %1 = vector.load %arg3[%c0_1, %c0_2] : memref<8x24xf32, #tpu.memory_space<vmem>>, vector<8x24xf32>
    %cst = arith.constant dense<0.000000e+00> : vector<8x128xf32>
    %2 = tpu.matmul %1, %0, %cst {dimension_numbers = #tpu.dot_dimension_numbers<[1], [0], [0], [1], [0, 0, 1, 1], [], []>} : vector<8x24xf32>, vector<24x128xf32>, vector<8x128xf32> -> vector<8x128xf32>
    %c0_3 = arith.constant 0 : index
    %c0_4 = arith.constant 0 : index
    %3 = vector.load %arg5[%c0_3, %c0_4] : memref<8x1xf32, #tpu.memory_space<vmem>>, vector<8x1xf32>
    %4 = vector.broadcast %3 : vector<8x1xf32> to vector<8x128xf32>
    %5 = arith.addf %2, %4 : vector<8x128xf32>
    %c0_5 = arith.constant 0 : index
    %c0_6 = arith.constant 0 : index
    %6 = vector.load %arg4[%c0_5, %c0_6] : memref<8x24xf32, #tpu.memory_space<vmem>>, vector<8x24xf32>
    %cst_7 = arith.constant dense<0.000000e+00> : vector<8x128xf32>
    %7 = tpu.matmul %6, %0, %cst_7 {dimension_numbers = #tpu.dot_dimension_numbers<[1], [0], [0], [1], [0, 0, 1, 1], [], []>} : vector<8x24xf32>, vector<24x128xf32>, vector<8x128xf32> -> vector<8x128xf32>
    %c0_8 = arith.constant 0 : index
    %c0_9 = arith.constant 0 : index
    %8 = vector.load %arg6[%c0_8, %c0_9] : memref<8x1xf32, #tpu.memory_space<vmem>>, vector<8x1xf32>
    %9 = vector.broadcast %8 : vector<8x1xf32> to vector<8x128xf32>
    %10 = arith.addf %7, %9 : vector<8x128xf32>
    %11 = math.tanh %5 : vector<8x128xf32>
    %12 = arith.negf %10 : vector<8x128xf32>
    %13 = math.exp %12 : vector<8x128xf32>
    %cst_10 = arith.constant 1.000000e+00 : f32
    %14 = vector.broadcast %cst_10 : f32 to vector<8x128xf32>
    %15 = arith.addf %14, %13 : vector<8x128xf32>
    %16 = arith.divf %14, %15 : vector<8x128xf32>
    %17 = arith.mulf %11, %16 : vector<8x128xf32>
    %c0_11 = arith.constant 0 : index
    %c0_12 = arith.constant 0 : index
    %18 = vector.load %arg7[%c0_11, %c0_12] : memref<8x8xf32, #tpu.memory_space<vmem>>, vector<8x8xf32>
    %cst_13 = arith.constant dense<0.000000e+00> : vector<8x128xf32>
    %19 = tpu.matmul %18, %17, %cst_13 {dimension_numbers = #tpu.dot_dimension_numbers<[1], [0], [0], [1], [0, 0, 1, 1], [], []>} : vector<8x8xf32>, vector<8x128xf32>, vector<8x128xf32> -> vector<8x128xf32>
    %c0_14 = arith.constant 0 : index
    %c0_15 = arith.constant 0 : index
    %20 = vector.load %arg8[%c0_14, %c0_15] : memref<8x1xf32, #tpu.memory_space<vmem>>, vector<8x1xf32>
    %21 = vector.broadcast %20 : vector<8x1xf32> to vector<8x128xf32>
    %22 = arith.addf %19, %21 : vector<8x128xf32>
    %c0_16 = arith.constant 0 : index
    %c0_17 = arith.constant 0 : index
    %23 = vector.load %arg2[%c0_16, %c0_17] : memref<8x128xf32, #tpu.memory_space<vmem>>, vector<8x128xf32>
    %24 = arith.addf %22, %23 : vector<8x128xf32>
    %c0_18 = arith.constant 0 : index
    %c0_19 = arith.constant 0 : index
    %25 = vector.load %arg9[%c0_18, %c0_19] : memref<8x128xf32, #tpu.memory_space<vmem>>, vector<8x128xf32>
    tpu.vector_store %arg9[%c0_18, %c0_19], %24 {strides = array<i32>} : memref<8x128xf32, #tpu.memory_space<vmem>>, vector<8x128xf32>,
    return
  }
  func.func @transform_0(%arg0: i32) -> (i32, i32) {
    %c0_i32 = arith.constant 0 : i32
    %c0_i32_0 = arith.constant 0 : i32
    return %c0_i32, %arg0 : i32, i32
  }
  func.func @transform_1(%arg0: i32) -> (i32, i32) {
    %c0_i32 = arith.constant 0 : i32
    %c0_i32_0 = arith.constant 0 : i32
    return %c0_i32, %arg0 : i32, i32
  }
  func.func @transform_2(%arg0: i32) -> (i32, i32) {
    %c0_i32 = arith.constant 0 : i32
    %c0_i32_0 = arith.constant 0 : i32
    %c0_i32_1 = arith.constant 0 : i32
    return %c0_i32, %c0_i32_0 : i32, i32
  }
  func.func @transform_3(%arg0: i32) -> (i32, i32) {
    %c0_i32 = arith.constant 0 : i32
    %c0_i32_0 = arith.constant 0 : i32
    %c0_i32_1 = arith.constant 0 : i32
    return %c0_i32, %c0_i32_0 : i32, i32
  }
  func.func @transform_4(%arg0: i32) -> (i32, i32) {
    %c0_i32 = arith.constant 0 : i32
    %c0_i32_0 = arith.constant 0 : i32
    %c0_i32_1 = arith.constant 0 : i32
    return %c0_i32, %c0_i32_0 : i32, i32
  }
  func.func @transform_5(%arg0: i32) -> (i32, i32) {
    %c0_i32 = arith.constant 0 : i32
    %c0_i32_0 = arith.constant 0 : i32
    %c0_i32_1 = arith.constant 0 : i32
    return %c0_i32, %c0_i32_0 : i32, i32
  }
  func.func @transform_6(%arg0: i32) -> (i32, i32) {
    %c0_i32 = arith.constant 0 : i32
    %c0_i32_0 = arith.constant 0 : i32
    %c0_i32_1 = arith.constant 0 : i32
    return %c0_i32, %c0_i32_0 : i32, i32
  }
  func.func @transform_7(%arg0: i32) -> (i32, i32) {
    %c0_i32 = arith.constant 0 : i32
    %c0_i32_0 = arith.constant 0 : i32
    %c0_i32_1 = arith.constant 0 : i32
    return %c0_i32, %c0_i32_0 : i32, i32
  }
  func.func @transform_8(%arg0: i32) -> (i32, i32) {
    %c0_i32 = arith.constant 0 : i32
    %c0_i32_0 = arith.constant 0 : i32
    return %c0_i32, %arg0 : i32, i32
  }
}

</mosaic_0001>

<bundles_post_ra>
// kernel: tpu_custom_call.1
= control target key start
LH: loop header
LB: loop body
LE: loop exit
PB: predicated region body
PF: predicated region fallthrough
CT: control target
= control target key end

     0   :  { %13 = vsyncpa [#allocation3], 0  ;;  %s571_s0 = inlined_call_operand.vmem [shape: f32[24,128], index: 0, kind: input, shape index: {}]   ;;  %s572_s1 = inlined_call_operand.hbm [shape: f32[8,128], index: 1, kind: input, shape index: {}]   ;;  %s573_s2 = inlined_call_operand.vmem [shape: f32[8,24], index: 2, kind: input, shape index: {}]   ;;  %s574_s3 = inlined_call_operand.hbm [shape: f32[8,24], index: 3, kind: input, shape index: {}]   ;;  %s575_s4 = inlined_call_operand.vmem [shape: f32[8,1], index: 4, kind: input, shape index: {}]   ;;  %s576_s5 = inlined_call_operand.vmem [shape: f32[8,1], index: 5, kind: input, shape index: {}]   ;;  %s577_s6 = inlined_call_operand.vmem [shape: f32[8,8], index: 6, kind: input, shape index: {}]   ;;  %s578_s7 = inlined_call_operand.vmem [shape: f32[8,1], index: 7, kind: input, shape index: {}]   ;;  %s579_s8 = inlined_call_operand.hbm [shape: f32[8,128], index: 8, kind: output, shape index: {}]  }
   0x1   :  { %14 = vsyncpa [#allocation6], 0 }
   0x2   :  { %15 = vsyncpa [#allocation4], 0  ;;  %s456_s27 = smov [#allocation2]   ;;  %s457_s29 = smov [#allocation5]  }
   0x3   :  { %s24_s28 = sshll.u32 %s456_s27, 4  ;;  %s36_s30 = sshll.u32 %s457_s29, 4  ;;  %s25_s28 = int_to_ptr.vmem [resolvable:$true] %s24_s28  ;;  %s37_s30 = int_to_ptr.vmem [resolvable:$true] %s36_s30 }
   0x4   :  { %s384_s11 = scalar_lea.hbm %s572_s1, 128 }
   0x5   :  { %p385_p0 = scmp.ne.s32.totalorder %s572_s1, %s384_s11  ;;  %p388_p1 = scmp.lt.u32.totalorder %s384_s11, %s572_s1 }
   0x7   :  { %p390_p2 = pnand %p388_p1, %p385_p0 }
   0x9   :  { %393 = shalt.err (!%p390_p2)
}
   0xa   :  { %s394_s16 = scalar_lea.vmem %s25_s28, 128  ;;  %p399_p4 = scmp.lt.s32.totalorder %s25_s28, %s25_s28 }
   0xb   :  { %p395_p3 = scmp.ne.s32.totalorder %s25_s28, %s394_s16  ;;  %p400_p5 = scmp.lt.s32.totalorder %s394_s16, %s394_s16 }
   0xd   :  { %p401_p6 = por %p400_p5, %p399_p4 }
   0xf   :  { %p402_p7 = pnand %p401_p6, %p395_p3 }
  0x11   :  { %405 = shalt.err (!%p402_p7)
}
  0x12   :  { %27 = dma.hbm_to_vmem [thread:$0]  %s572_s1, 128, %s25_s28, [#allocation3]  }
  0x13   :  { %s406_s21 = scalar_lea.hbm %s574_s3, 128 }
  0x14   :  { %p407_p8 = scmp.ne.s32.totalorder %s574_s3, %s406_s21  ;;  %p410_p9 = scmp.lt.u32.totalorder %s406_s21, %s574_s3 }
  0x16   :  { %p412_p10 = pnand %p410_p9, %p407_p8 }
  0x18   :  { %415 = shalt.err (!%p412_p10)
}
  0x19   :  { %s416_s26 = scalar_lea.vmem %s37_s30, 128  ;;  %p421_p12 = scmp.lt.s32.totalorder %s37_s30, %s37_s30 }
  0x1a   :  { %p417_p11 = scmp.ne.s32.totalorder %s37_s30, %s416_s26  ;;  %p422_p13 = scmp.lt.s32.totalorder %s416_s26, %s416_s26 }
  0x1c   :  { %p423_p0 = por %p422_p13, %p421_p12 }
  0x1e   :  { %p424_p1 = pnand %p423_p0, %p417_p11 }
  0x20   :  { %427 = shalt.err (!%p424_p1)
}
  0x21   :  { %39 = dma.hbm_to_vmem [thread:$0]  %s574_s3, 128, %s37_s30, [#allocation6]  }
  0x22   :  { %450 = dma.done.wait [#allocation3], 128  }
  0x23   :  { %451 = vsyncadd [#allocation3], 4294967168 }
  0x24   :  { %452 = dma.done.wait [#allocation6], 128  }
  0x25   :  { %453 = vsyncadd [#allocation6], 4294967168  ;;  %v458_v0 = vmov 0.0|0.0   ;;  %vm459_vm0 = vmmov 0   ;;  %v460_v1 = vmov 0.0   ;;  %v461_v2 = vmov 0  }
  0x26   :  { %363 = vmatprep.subr.bf16.mxu0 %v458_v0  ;;  %366 = vmatprep.subr.bf16.mxu1 %v458_v0  ;;  %v54_v3 = vld [vmem:[%s571_s0] sm:$0xff]  ;;  %v55_v4 = vld [vmem:[%s571_s0 + $0x8] sm:$0xff]  ;;  %v56_v8 = vld [vmem:[%s571_s0 + $0x10] sm:$0xff]  ;;  %vm64_vm1 = vcmask 195584   ;;  %vm233_vm2 = vcmask 64512  }
  0x27   :  { %346 = vmatprep.mubr.msk.f32.mxu0 %vm459_vm0, %v460_v1  ;;  %355 = vmatprep.mubr.msk.f32.mxu1 %vm459_vm0, %v460_v1  ;;  %v364_v5 = vpack.c.bf16 %v55_v4, %v54_v3  ;;  %v139_v6 = vld [vmem:[%s576_s5] sm:$0xff]  ;;  %v138_v10 = vld [vmem:[#allocation5] sm:$0xff] }
  0x28   :  { %376 = vset.pattern.permute.xlu0 %v461_v2  ;;  %377 = vset.pattern.permute.xlu1 %v461_v2  ;;  %v58_v7 = vld [vmem:[%s575_s4] sm:$0xff] }
  0x29   :  { %142 = vperm.xlu0 %376, %v139_v6   ;;  %365 = vmatpush3.bf16.msra.mxu0 %v364_v5  ;;  %v57_v9 = vld [vmem:[%s573_s2] sm:$0xff] }
  0x2a   :  { %368 = vmatpush3.bf16.msra.mxu1 %v364_v5  ;;  %344 = vmatprep.subr.mxu0 %v460_v1  ;;  %v227_v11 = vld [vmem:[%s578_s7] sm:$0xff]  ;;  %s462_s7 = smov [#allocation7]  }
  0x2b   :  { %353 = vmatprep.subr.mxu1 %v460_v1  ;;  %230 = vperm.xlu1 %377, %v227_v11   ;;  %v226_v26 = vld [vmem:[%s577_s6] sm:$0xff]  ;;  %s316_s17 = sshll.u32 %s462_s7, 4  ;;  %s317_s17 = int_to_ptr.vmem [resolvable:$true] %s316_s17 }
  0x2c   :  { %v307_v29 = vld [vmem:[#allocation2] sm:$0xff]  ;;  %s428_s18 = scalar_lea.vmem %s317_s17, 128  ;;  %p433_p3 = scmp.lt.s32.totalorder %s317_s17, %s317_s17 }
  0x2d   :  { %61 = vperm.xlu0 %376, %v58_v7   ;;  %345 = vmatpush3.msra.mxu0 %v56_v8  ;;  %p429_p2 = scmp.ne.s32.totalorder %s317_s17, %s428_s18  ;;  %p434_p4 = scmp.lt.s32.totalorder %s428_s18, %s428_s18 }
  0x2e   :  { %354 = vmatpush3.msra.mxu1 %v56_v8  ;;  %347 = vmatmul.mubr.msk.f32.vlgmr.msra.gmra.mrb[0].mxu0 %vm64_vm1, %v57_v9 }
  0x2f   :  { %356 = vmatmul.mubr.msk.f32.vlgmr.msra.gmra.mrb[0].mxu1 %vm64_vm1, %v138_v10  ;;  %358 = vmatprep.subr.mxu0 %v460_v1  ;;  %p435_p5 = por %p434_p4, %p433_p3 }
  0x30   :  { %360 = vmatprep.mubr.msk.f32.mxu0 %vm459_vm0, %v460_v1 }
  0x31   :  { %p436_p6 = pnand %p435_p5, %p429_p2 }
  0xa8   :  { %v143_v12 = vpop.permute.xlu0 %142 }
  0xaa   :  { %v231_v27 = vpop.permute.xlu1 %230 }
  0xac   :  { %v62_v19 = vpop.permute.xlu0 %61 }
 0x101   :  { %v134_v13 = vpop.f32.mrb[0].mxu0 }
 0x102   :  { %v214_v14 = vpop.f32.mrb[0].mxu1  ;;  %v348_v17 = vpop.f32.mrb[1].mxu0  ;;  %v135_v20 = vadd.f32 %v134_v13, %v62_v19 }
 0x103   :  { %v215_v15 = vadd.f32 %v214_v14, %v143_v12  ;;  %v357_v16 = vpop.f32.mrb[1].mxu1 }
 0x105   :  { %v328_v18 = vmul.f32 -1.442695, %v215_v15 }
 0x107   :  { %378 = vpow2.f32 %v328_v18 }
 0x108   :  { %380 = vtanh.f32 %v135_v20 }
 0x111   :  { %v379_v21 = vpop.eup %378 }
 0x112   :  { %v222_v22 = vadd.f32 1.0, %v379_v21  ;;  %v381_v23 = vpop.eup %380 }
 0x114   :  { %382 = vrcp.f32 %v222_v22 }
 0x11e   :  { %v383_v24 = vpop.eup %382 }
 0x11f   :  { %v225_v25 = vmul.f32 %v383_v24, %v381_v23 }
 0x121   :  { %359 = vmatpush3.msra.mxu0 %v225_v25 }
 0x122   :  { %361 = vmatmul.mubr.msk.f32.vlgmr.msra.gmra.mrb[2].mxu0 %vm233_vm2, %v226_v26 }
 0x1f5   :  { %v303_v28 = vpop.f32.mrb[2].mxu0 }
 0x1f6   :  { %v304_v30 = vadd.f32 %v303_v28, %v231_v27  ;;  %v362_v31 = vpop.f32.mrb[3].mxu0 }
 0x1f8   :  { %v308_v32 = vadd.f32 %v307_v29, %v304_v30 }
 0x1fa   :  { %309 = vst [vmem:[#allocation7] sm:$0xff] %v308_v32 }
 0x1fb   :  { %439 = shalt.err (!%p436_p6)
}
 0x1fc   :  { %s440_s20 = scalar_lea.hbm %s579_s8, 128 }
 0x1fd   :  { %p441_p7 = scmp.ne.s32.totalorder %s579_s8, %s440_s20  ;;  %p444_p8 = scmp.lt.u32.totalorder %s440_s20, %s579_s8 }
 0x1ff   :  { %p446_p9 = pnand %p444_p8, %p441_p7 }
 0x201   :  { %449 = shalt.err (!%p446_p9)
}
 0x202   :  { %319 = dma.vmem_to_hbm [thread:$0]  %s317_s17, 128, %s579_s8, [#allocation4]  }
 0x203   :  { %454 = dma.done.wait [#allocation4], 128  }
 0x204   :  { %455 = vsyncadd [#allocation4], 4294967168 }
 0x205   :  { %323 = vsyncpa [#allocation3], 1 }
 0x206   :  { %324 = vsyncpa [#allocation6], 1 }
 0x207   :  { %325 = vsyncpa [#allocation4], 1 }

</bundles_post_ra>
